<compile_context>
chip_gen: v6e
topology: v6e:2x2x1
jax: 0.10.0
libtpu: 0.0.40
codegen_flags: <defaults>
</compile_context>

<pallas_src>
import functools

import jax
import jax.numpy as jnp
from jax import lax
from jax.experimental import pallas as pl
from jax.experimental.pallas import tpu as pltpu


def _round_up(x, m):
    return (x + m - 1) // m * m


def role_embedding_kernel(x_ref, w_ref, b_ref, g_ref, beta_ref, out_ref, *,
                          use_ln, n_real, eps):
    # Linear: bf16 operands on the MXU, f32 accumulate, bias add in f32.
    h = jnp.dot(x_ref[...].astype(jnp.bfloat16), w_ref[...],
                preferred_element_type=jnp.float32)
    h = h + b_ref[...]                                   # padded lanes stay exactly 0

    if use_ln:
        # LayerNorm over the n_real valid lanes only (zero-padded lanes excluded).
        mask = lax.broadcasted_iota(jnp.int32, h.shape, 1) < n_real
        inv_n = 1.0 / float(n_real)
        mean = jnp.sum(h, axis=-1, keepdims=True) * inv_n       # pads contribute 0
        centered = jnp.where(mask, h - mean, 0.0)
        var = jnp.sum(centered * centered, axis=-1, keepdims=True) * inv_n
        h = centered * lax.rsqrt(var + eps)
        h = h * g_ref[...] + beta_ref[...]

    # Sigmoid (exp on the EUP); padded lanes produce junk that is sliced off outside.
    out_ref[...] = 1.0 / (1.0 + jnp.exp(-h))


def role_embedding_forward(agent_embedding, params, *, use_ln, eps=1e-5,
                           batch_tile=256):
    """agent_embedding: (B, agent_embedding_dim) f32 -> (B, role_embedding_dim) f32."""
    B, d_in = agent_embedding.shape
    w = params["w"]                      # (d_in, n) — (in, out) layout, == Linear.weight.T
    b = params["b"]                      # (n,)
    n = w.shape[1]
    n_pad = _round_up(n, 128)            # lane-dense output

    # Batch tile: multiple of 8 sublanes, capped so tiles stay small on v7x VMEM.
    tb = min(_round_up(B, 8), batch_tile)
    b_pad = _round_up(B, tb)

    x_p = jnp.zeros((b_pad, d_in), jnp.float32).at[:B].set(
        agent_embedding.astype(jnp.float32))
    w_p = jnp.zeros((d_in, n_pad), jnp.float32).at[:, :n].set(w).astype(jnp.bfloat16)
    b_p = jnp.zeros((1, n_pad), jnp.float32).at[0, :n].set(b)
    if use_ln:
        g_p = jnp.zeros((1, n_pad), jnp.float32).at[0, :n].set(params["gamma"])
        beta_p = jnp.zeros((1, n_pad), jnp.float32).at[0, :n].set(params["beta"])
    else:
        g_p = jnp.ones((1, n_pad), jnp.float32)
        beta_p = jnp.zeros((1, n_pad), jnp.float32)

    grid = (b_pad // tb,)
    resident = lambda i: (0, 0)          # weights/biases pinned in VMEM across steps

    # Advisory cost estimate.
    flops = 2 * b_pad * d_in * n_pad + (6 * b_pad * n_pad if use_ln else 0)
    transcendentals = b_pad * n_pad + (b_pad if use_ln else 0)
    bytes_accessed = (x_p.size * 4 + w_p.size * 2 + b_p.size * 4
                      + g_p.size * 4 + beta_p.size * 4 + b_pad * n_pad * 4)

    # VMEM budget: 2x (double-buffered x/out tiles) + resident params, with headroom.
    tile_bytes = 2 * (tb * d_in * 4 + tb * n_pad * 4)
    param_bytes = w_p.size * 2 + 3 * (n_pad * 4)
    vmem_limit = int(min(128 * 1024 * 1024,
                         max(4 * 1024 * 1024, 2 * (tile_bytes + param_bytes))))

    out = pl.pallas_call(
        functools.partial(role_embedding_kernel, use_ln=use_ln, n_real=n, eps=eps),
        out_shape=jax.ShapeDtypeStruct((b_pad, n_pad), jnp.float32),
        grid_spec=pltpu.PrefetchScalarGridSpec(
            num_scalar_prefetch=0,
            grid=grid,
            in_specs=[
                pl.BlockSpec((tb, d_in), lambda i: (i, 0)),     # streams over batch
                pl.BlockSpec((d_in, n_pad), resident),
                pl.BlockSpec((1, n_pad), resident),
                pl.BlockSpec((1, n_pad), resident),
                pl.BlockSpec((1, n_pad), resident),
            ],
            out_specs=pl.BlockSpec((tb, n_pad), lambda i: (i, 0)),
        ),
        compiler_params=pltpu.CompilerParams(
            dimension_semantics=("parallel",),
            vmem_limit_bytes=vmem_limit,
        ),
        cost_estimate=pl.CostEstimate(
            flops=flops,
            transcendentals=transcendentals,
            bytes_accessed=bytes_accessed),
    )(x_p, w_p, b_p, g_p, beta_p)

    return out[:B, :n]


def init_params(key, *, agent_embedding_dim, role_embedding_dim, use_ln):
    """Deterministic synthetic params (Linear weight stored as (in, out))."""
    ks = jax.random.split(key, 4)
    s = 0.1
    p = {
        "w": s * jax.random.normal(ks[0], (agent_embedding_dim, role_embedding_dim),
                                   jnp.float32),
        "b": s * jax.random.normal(ks[1], (role_embedding_dim,), jnp.float32),
    }
    if use_ln:
        p["gamma"] = 1.0 + s * jax.random.normal(ks[2], (role_embedding_dim,),
                                                 jnp.float32)
        p["beta"] = s * jax.random.normal(ks[3], (role_embedding_dim,), jnp.float32)
    return p


def reference_forward(x, params, *, use_ln, eps=1e-5):
    """Plain-JAX (f32) reference matching the PyTorch forward."""
    h = x @ params["w"] + params["b"]
    if use_ln:
        mean = jnp.mean(h, axis=-1, keepdims=True)
        var = jnp.mean((h - mean) ** 2, axis=-1, keepdims=True)
        h = (h - mean) / jnp.sqrt(var + eps)
        h = h * params["gamma"] + params["beta"]
    return jax.nn.sigmoid(h)


if __name__ == "__main__":
    # Small shapes consistent with the module.
    B = 8
    agent_embedding_dim = 32
    role_embedding_dim = 16

    key = jax.random.PRNGKey(0)
    k_p_ln, k_p, k_x = jax.random.split(key, 3)
    x = jax.random.normal(k_x, (B, agent_embedding_dim), jnp.float32)

    ok = True
    for use_ln, k in ((True, k_p_ln), (False, k_p)):
        params = init_params(k,
                             agent_embedding_dim=agent_embedding_dim,
                             role_embedding_dim=role_embedding_dim,
                             use_ln=use_ln)
        out = jax.block_until_ready(
            role_embedding_forward(x, params, use_ln=use_ln))
        ref = reference_forward(x, params, use_ln=use_ln)
        ok &= out.shape == (B, role_embedding_dim)
        # bf16 MXU operands -> slightly looser tolerance than pure f32.
        ok &= bool(jnp.allclose(out, ref, atol=2e-2, rtol=2e-2))

    assert ok
    print("KERNEL_OK")
</pallas_src>

<mosaic_0001>
module attributes {stable_mosaic.version = 11 : i64} {
  func.func @role_embedding_kernel(%arg0: i32, %arg1: memref<8x32xf32, #tpu.memory_space<vmem>>, %arg2: memref<32x128xbf16, #tpu.memory_space<vmem>>, %arg3: memref<1x128xf32, #tpu.memory_space<vmem>>, %arg4: memref<1x128xf32, #tpu.memory_space<vmem>>, %arg5: memref<1x128xf32, #tpu.memory_space<vmem>>, %arg6: memref<8x128xf32, #tpu.memory_space<vmem>>) attributes {dimension_semantics = [#tpu.dimension_semantics<parallel>], iteration_bounds = array<i64: 1>, scalar_prefetch = 0 : i64, scratch_operands = 0 : i64, tpu.core_type = #tpu.core_type<tc>, window_params = [{transform_indices = @transform_0, window_bounds = array<i64: 8, 32>}, {pipeline_mode = #tpu.pipeline_mode<synchronous>, transform_indices = @transform_1, window_bounds = array<i64: 32, 128>}, {pipeline_mode = #tpu.pipeline_mode<synchronous>, transform_indices = @transform_2, window_bounds = array<i64: 1, 128>}, {pipeline_mode = #tpu.pipeline_mode<synchronous>, transform_indices = @transform_3, window_bounds = array<i64: 1, 128>}, {pipeline_mode = #tpu.pipeline_mode<synchronous>, transform_indices = @transform_4, window_bounds = array<i64: 1, 128>}, {transform_indices = @transform_5, window_bounds = array<i64: 8, 128>}]} {
    %c0 = arith.constant 0 : index
    %c0_0 = arith.constant 0 : index
    %0 = vector.load %arg1[%c0, %c0_0] : memref<8x32xf32, #tpu.memory_space<vmem>>, vector<8x32xf32>
    %1 = arith.truncf %0 : vector<8x32xf32> to vector<8x32xbf16>
    %c0_1 = arith.constant 0 : index
    %c0_2 = arith.constant 0 : index
    %2 = vector.load %arg2[%c0_1, %c0_2] : memref<32x128xbf16, #tpu.memory_space<vmem>>, vector<32x128xbf16>
    %cst = arith.constant dense<0.000000e+00> : vector<8x128xf32>
    %3 = tpu.matmul %1, %2, %cst {dimension_numbers = #tpu.dot_dimension_numbers<[1], [0], [0], [1], [0, 0, 1, 1], [], []>} : vector<8x32xbf16>, vector<32x128xbf16>, vector<8x128xf32> -> vector<8x128xf32>
    %c0_3 = arith.constant 0 : index
    %c0_4 = arith.constant 0 : index
    %4 = vector.load %arg3[%c0_3, %c0_4] : memref<1x128xf32, #tpu.memory_space<vmem>>, vector<1x128xf32>
    %5 = vector.broadcast %4 : vector<1x128xf32> to vector<8x128xf32>
    %6 = arith.addf %3, %5 : vector<8x128xf32>
    %7 = tpu.iota {dimensions = array<i32: 1>} : vector<8x128xi32>
    %c16_i32 = arith.constant 16 : i32
    %8 = vector.broadcast %c16_i32 : i32 to vector<8x128xi32>
    %9 = arith.cmpi slt, %7, %8 : vector<8x128xi32>
    %cst_5 = arith.constant dense<0.000000e+00> : vector<8xf32>
    %10 = vector.multi_reduction <add>, %6, %cst_5 [1] : vector<8x128xf32> to vector<8xf32>
    %11 = vector.shape_cast %10 : vector<8xf32> to vector<8x1xf32>
    %cst_6 = arith.constant 6.250000e-02 : f32
    %12 = vector.broadcast %cst_6 : f32 to vector<8x1xf32>
    %13 = arith.mulf %11, %12 : vector<8x1xf32>
    %14 = vector.broadcast %13 : vector<8x1xf32> to vector<8x128xf32>
    %15 = arith.subf %6, %14 : vector<8x128xf32>
    %cst_7 = arith.constant 0.000000e+00 : f32
    %16 = vector.broadcast %cst_7 : f32 to vector<8x128xf32>
    %17 = arith.select %9, %15, %16 : vector<8x128xi1>, vector<8x128xf32>
    %18 = arith.mulf %17, %17 : vector<8x128xf32>
    %cst_8 = arith.constant dense<0.000000e+00> : vector<8xf32>
    %19 = vector.multi_reduction <add>, %18, %cst_8 [1] : vector<8x128xf32> to vector<8xf32>
    %20 = vector.shape_cast %19 : vector<8xf32> to vector<8x1xf32>
    %cst_9 = arith.constant 6.250000e-02 : f32
    %21 = vector.broadcast %cst_9 : f32 to vector<8x1xf32>
    %22 = arith.mulf %20, %21 : vector<8x1xf32>
    %cst_10 = arith.constant 9.99999974E-6 : f32
    %23 = vector.broadcast %cst_10 : f32 to vector<8x1xf32>
    %24 = arith.addf %22, %23 : vector<8x1xf32>
    %25 = math.rsqrt %24 : vector<8x1xf32>
    %26 = vector.broadcast %25 : vector<8x1xf32> to vector<8x128xf32>
    %27 = arith.mulf %17, %26 : vector<8x128xf32>
    %c0_11 = arith.constant 0 : index
    %c0_12 = arith.constant 0 : index
    %28 = vector.load %arg4[%c0_11, %c0_12] : memref<1x128xf32, #tpu.memory_space<vmem>>, vector<1x128xf32>
    %29 = vector.broadcast %28 : vector<1x128xf32> to vector<8x128xf32>
    %30 = arith.mulf %27, %29 : vector<8x128xf32>
    %c0_13 = arith.constant 0 : index
    %c0_14 = arith.constant 0 : index
    %31 = vector.load %arg5[%c0_13, %c0_14] : memref<1x128xf32, #tpu.memory_space<vmem>>, vector<1x128xf32>
    %32 = vector.broadcast %31 : vector<1x128xf32> to vector<8x128xf32>
    %33 = arith.addf %30, %32 : vector<8x128xf32>
    %cst_15 = arith.constant 0.000000e+00 : f32
    %34 = vector.broadcast %cst_15 : f32 to vector<8x128xf32>
    %35 = arith.subf %34, %33 : vector<8x128xf32>
    %36 = math.exp %35 : vector<8x128xf32>
    %cst_16 = arith.constant 1.000000e+00 : f32
    %37 = vector.broadcast %cst_16 : f32 to vector<8x128xf32>
    %38 = arith.addf %37, %36 : vector<8x128xf32>
    %cst_17 = arith.constant 1.000000e+00 : f32
    %39 = vector.broadcast %cst_17 : f32 to vector<8x128xf32>
    %40 = arith.divf %39, %38 : vector<8x128xf32>
    %c0_18 = arith.constant 0 : index
    %c0_19 = arith.constant 0 : index
    %41 = vector.load %arg6[%c0_18, %c0_19] : memref<8x128xf32, #tpu.memory_space<vmem>>, vector<8x128xf32>
    tpu.vector_store %arg6[%c0_18, %c0_19], %40 {strides = array<i32>} : memref<8x128xf32, #tpu.memory_space<vmem>>, vector<8x128xf32>,
    return
  }
  func.func @transform_0(%arg0: i32) -> (i32, i32) {
    %c0_i32 = arith.constant 0 : i32
    %c0_i32_0 = arith.constant 0 : i32
    return %arg0, %c0_i32 : i32, i32
  }
  func.func @transform_1(%arg0: i32) -> (i32, i32) {
    %c0_i32 = arith.constant 0 : i32
    %c0_i32_0 = arith.constant 0 : i32
    %c0_i32_1 = arith.constant 0 : i32
    return %c0_i32, %c0_i32_0 : i32, i32
  }
  func.func @transform_2(%arg0: i32) -> (i32, i32) {
    %c0_i32 = arith.constant 0 : i32
    %c0_i32_0 = arith.constant 0 : i32
    %c0_i32_1 = arith.constant 0 : i32
    return %c0_i32, %c0_i32_0 : i32, i32
  }
  func.func @transform_3(%arg0: i32) -> (i32, i32) {
    %c0_i32 = arith.constant 0 : i32
    %c0_i32_0 = arith.constant 0 : i32
    %c0_i32_1 = arith.constant 0 : i32
    return %c0_i32, %c0_i32_0 : i32, i32
  }
  func.func @transform_4(%arg0: i32) -> (i32, i32) {
    %c0_i32 = arith.constant 0 : i32
    %c0_i32_0 = arith.constant 0 : i32
    %c0_i32_1 = arith.constant 0 : i32
    return %c0_i32, %c0_i32_0 : i32, i32
  }
  func.func @transform_5(%arg0: i32) -> (i32, i32) {
    %c0_i32 = arith.constant 0 : i32
    %c0_i32_0 = arith.constant 0 : i32
    return %arg0, %c0_i32 : i32, i32
  }
}

</mosaic_0001>

<bundles_post_ra>
// kernel: tpu_custom_call.1
= control target key start
LH: loop header
LB: loop body
LE: loop exit
PB: predicated region body
PF: predicated region fallthrough
CT: control target
= control target key end

     0   :  { %10 = vsyncpa [#allocation3], 0  ;;  %s324_s0 = inlined_call_operand.hbm [shape: f32[8,32], index: 0, kind: input, shape index: {}]   ;;  %s325_s1 = inlined_call_operand.hbm [shape: bf16[32,128], index: 1, kind: input, shape index: {}]   ;;  %s326_s2 = inlined_call_operand.vmem [shape: f32[1,128], index: 2, kind: input, shape index: {}]   ;;  %s327_s3 = inlined_call_operand.vmem [shape: f32[1,128], index: 3, kind: input, shape index: {}]   ;;  %s328_s4 = inlined_call_operand.vmem [shape: f32[1,128], index: 4, kind: input, shape index: {}]   ;;  %s329_s5 = inlined_call_operand.hbm [shape: f32[8,128], index: 5, kind: output, shape index: {}]  }
   0x1   :  { %11 = vsyncpa [#allocation6], 0 }
   0x2   :  { %12 = vsyncpa [#allocation4], 0  ;;  %s269_s18 = smov [#allocation2]   ;;  %s270_s20 = smov [#allocation5]  }
   0x3   :  { %s19_s19 = sshll.u32 %s269_s18, 4  ;;  %s28_s21 = sshll.u32 %s270_s20, 4  ;;  %s20_s19 = int_to_ptr.vmem [resolvable:$true] %s19_s19  ;;  %s29_s21 = int_to_ptr.vmem [resolvable:$true] %s28_s21 }
   0x4   :  { %s211_s22 = scalar_lea.vmem %s20_s19, 128  ;;  %p216_p1 = scmp.lt.s32.totalorder %s20_s19, %s20_s19 }
   0x5   :  { %p212_p0 = scmp.ne.s32.totalorder %s20_s19, %s211_s22  ;;  %p217_p2 = scmp.lt.s32.totalorder %s211_s22, %s211_s22 }
   0x7   :  { %p218_p3 = por %p217_p2, %p216_p1 }
   0x9   :  { %p219_p4 = pnand %p218_p3, %p212_p0 }
   0xb   :  { %222 = shalt.err (!%p219_p4)
}
   0xc   :  { %22 = dma.hbm_to_vmem [thread:$0]  %s324_s0, 128, %s20_s19, [#allocation3]  }
   0xd   :  { %s231_s25 = scalar_lea.vmem %s29_s21, 256  ;;  %p236_p6 = scmp.lt.s32.totalorder %s29_s21, %s29_s21 }
   0xe   :  { %p232_p5 = scmp.ne.s32.totalorder %s29_s21, %s231_s25  ;;  %p237_p7 = scmp.lt.s32.totalorder %s231_s25, %s231_s25 }
  0x10   :  { %p238_p8 = por %p237_p7, %p236_p6 }
  0x12   :  { %p239_p9 = pnand %p238_p8, %p232_p5 }
  0x14   :  { %242 = shalt.err (!%p239_p9)
}
  0x15   :  { %s271_s26 = smov 64   ;;  %s272_s27 = smov 4  }
  0x16   :  { %34 = dma.hbm_to_vmem [thread:$0]  %s325_s1, 256, %s29_s21, [#allocation6], %s271_s26, %s271_s26, %s272_s27  }
  0x17   :  { %263 = dma.done.wait [#allocation3], 128  }
  0x18   :  { %264 = vsyncadd [#allocation3], 4294967168 }
  0x19   :  { %265 = dma.done.wait [#allocation6], 256  }
  0x1a   :  { %266 = vsyncadd [#allocation6], 4294967040  ;;  %v273_v0 = vmov 0.0   ;;  %vm274_vm0 = vmmov 0   ;;  %v195_v1 = vld [vmem:[#allocation5 + $0x8] sm:$0xff]   ;;  %v196_v2 = vld [vmem:[#allocation5] sm:$0xff]   ;;  %v117_v11 = vlaneseq }
  0x1b   :  { %180 = vmatprep.subr.bf16.mxu0 %v273_v0  ;;  %184 = vmatprep.mubr.msk.bf16.mxu0 %vm274_vm0, %v273_v0  ;;  %v48_v3 = vld [vmem:[#allocation2] sm:$0xff]  ;;  %vm73_vm1 = vcmask 261120   ;;  %s275_s8 = smov [#allocation7]  }
  0x1c   :  { %181 = vmatpush3.bf16.msra.mxu0 %v195_v1  ;;  %v49_v4 = vpack.c.bf16 %v48_v3, %v48_v3  ;;  %v171_v5 = vld [vmem:[%s326_s2] ss:$0 sm:$0xff]  ;;  %v118_v12 = vand.u32 127, %v117_v11  ;;  %s161_s9 = sshll.u32 %s275_s8, 4  ;;  %s162_s9 = int_to_ptr.vmem [resolvable:$true] %s161_s9 }
  0x1d   :  { %182 = vmatprep.subr.bf16.mxu0 %v273_v0  ;;  %v175_v22 = vld [vmem:[%s327_s3] ss:$0 sm:$0xff]  ;;  %s243_s10 = scalar_lea.vmem %s162_s9, 128  ;;  %p248_p11 = scmp.lt.s32.totalorder %s162_s9, %s162_s9 }
  0x1e   :  { %vm119_vm2 = vcmp.lt.s32.totalorder %v118_v12, 16  ;;  %v176_v24 = vld [vmem:[%s328_s4] ss:$0 sm:$0xff]  ;;  %p244_p10 = scmp.ne.s32.totalorder %s162_s9, %s243_s10  ;;  %p249_p12 = scmp.lt.s32.totalorder %s243_s10, %s243_s10 }
  0x20   :  { %183 = vmatpush3.bf16.msra.mxu0 %v196_v2  ;;  %p250_p13 = por %p249_p12, %p248_p11 }
  0x22   :  { %p251_p0 = pnand %p250_p13, %p244_p10 }
  0x23   :  { %185 = vmatmul.mubr.msk.bf16.vlgmr.msra.gmra.mxu0 %vm73_vm1, %v49_v4 }
  0xe3   :  { %v111_v6 = vpop.f32.mrf.mxu0 }
  0xe4   :  { %v112_v7 = vadd.f32 %v171_v5, %v111_v6 }
  0xe5   :  { %v186_v8 = vpop.f32.mrf.mxu0 }
  0xe6   :  { %120 = vadd.xlane.f32.xlu0 %v112_v7 }
  0xe7   :  { %v114_v9 = vpop.f32.mrf.mxu0 }
  0xe9   :  { %v187_v10 = vpop.f32.mrf.mxu0 }
 0x16f   :  { %v121_v13 = vpop.xlane.xlu0 %120 }
 0x170   :  { %v122_v14 = vmul.f32 0.0625, %v121_v13 }
 0x172   :  { %v123_v15 = vsub.f32 %v112_v7, %v122_v14 }
 0x174   :  { %v124_v16 = vsel %vm119_vm2, %v123_v15, 0.0 }
 0x175   :  { %v125_v17 = vmul.f32 %v124_v16, %v124_v16 }
 0x177   :  { %126 = vadd.xlane.f32.xlu0 %v125_v17 }
 0x200   :  { %v127_v18 = vpop.xlane.xlu0 %126 }
 0x201   :  { %v128_v19 = vmul.f32 0.0625, %v127_v18 }
 0x203   :  { %v129_v20 = vadd.f32 1e-05, %v128_v19 }
 0x205   :  { %197 = vrsqrt.f32 %v129_v20 }
 0x212   :  { %v198_v21 = vpop.eup %197 }
 0x213   :  { %v131_v23 = vmul.f32 %v198_v21, %v124_v16 }
 0x215   :  { %v139_v25 = vmul.f32 %v175_v22, %v131_v23 }
 0x217   :  { %v147_v26 = vadd.f32 %v176_v24, %v139_v25 }
 0x219   :  { %v148_v27 = vsub.f32 0.0, %v147_v26 }
 0x21b   :  { %v149_v28 = vmul.f32 1.442695, %v148_v27 }
 0x21d   :  { %199 = vpow2.f32 %v149_v28 }
 0x22a   :  { %v200_v29 = vpop.eup %199 }
 0x22b   :  { %v151_v30 = vadd.f32 1.0, %v200_v29 }
 0x22d   :  { %201 = vrcp.f32 %v151_v30 }
 0x23a   :  { %v202_v31 = vpop.eup %201 }
 0x23b   :  { %154 = vst [vmem:[#allocation7] sm:$0xff] %v202_v31 }
 0x23c   :  { %254 = shalt.err (!%p251_p0)
}
 0x23d   :  { %164 = dma.vmem_to_hbm [thread:$0]  %s162_s9, 128, %s329_s5, [#allocation4]  }
 0x23e   :  { %267 = dma.done.wait [#allocation4], 128  }
 0x23f   :  { %268 = vsyncadd [#allocation4], 4294967168 }
 0x240   :  { %168 = vsyncpa [#allocation3], 1 }
 0x241   :  { %169 = vsyncpa [#allocation6], 1 }
 0x242   :  { %170 = vsyncpa [#allocation4], 1 }

</bundles_post_ra>
